<compile_context>
chip_gen: v7x
topology: tpu7x:2x2x1
jax: 0.10.0
libtpu: 0.0.40
codegen_flags: <defaults>
</compile_context>

<pallas_src>
import jax
import jax.numpy as jnp
from jax.experimental import pallas as pl
from jax.experimental.pallas import tpu as pltpu


# ~4 MiB per input block (see header comment).
_TARGET_BLOCK_BYTES = 4 * 1024 * 1024


def _normalize_kernel(img_ref, scale_ref, bias_ref, out_ref):
    # img_ref:   (rb, cb) lane-dense slab of the flattened (N*C, H*W) image.
    # scale_ref: (rb, 1)  per-row 1/std (compute dtype), broadcast across lanes.
    # bias_ref:  (rb, 1)  per-row -mean/std.
    x = img_ref[...].astype(scale_ref.dtype)
    out_ref[...] = (x * scale_ref[...] + bias_ref[...]).astype(out_ref.dtype)


def _tpu_generation():
    """Best-effort TPU generation number (5, 6, 7, ...) or None."""
    try:
        kind = jax.devices()[0].device_kind.lower()
    except Exception:
        return None
    for gen in (7, 6, 5, 4):
        if f"v{gen}" in kind:
            return gen
    return None


def _sublane_pack(dtype):
    """Native sublane packing: 8 for 4-byte, 16 for 2-byte, 32 for 1-byte."""
    itemsize = jnp.dtype(dtype).itemsize
    return max(8, 32 // max(1, itemsize))


def _block_sizes(rows, hw, in_dtype):
    """Pick (row_block, col_block) for the flattened (rows, hw) view."""
    itemsize = jnp.dtype(in_dtype).itemsize
    pack = _sublane_pack(in_dtype)
    target_elems = max(pack * 128, _TARGET_BLOCK_BYTES // itemsize)

    # Column (lane) block: full H*W whenever `pack` rows of it fit the budget;
    # otherwise a large multiple of 128 (long contiguous DMA runs, unmasked
    # lane-dense stores). Only grow rows past `pack` once cb is maxed.
    if pack * hw <= target_elems or hw <= 128:
        cb = hw
    else:
        cb = max(128, (target_elems // pack // 128) * 128)
        cb = min(cb, hw)

    # Row (sublane) block: fill the budget, rounded UP to the dtype's sublane
    # packing (the explicit vmem_limit below is sized from the actual block).
    rb = max(1, target_elems // cb)
    if rb >= rows:
        rb = rows
    else:
        rb = ((rb + pack - 1) // pack) * pack
        rb = min(rb, rows)
    return rb, cb


def normalization_forward(img, mean, std):
    """Pallas equivalent of Normalization.forward.

    img:  (N, C, H, W)  any float or integer dtype
    mean: (C,) or (C, 1, 1)
    std:  (C,) or (C, 1, 1)
    """
    N, C, H, W = img.shape
    HW = H * W
    rows = N * C

    in_dtype = jnp.dtype(img.dtype)
    # PyTorch's (img - mean)/std returns a floating result; never cast back to
    # an integer input dtype.
    if jnp.issubdtype(in_dtype, jnp.floating):
        out_dtype = in_dtype
    else:
        out_dtype = jnp.dtype(jnp.float32)

    # Compute dtype: bf16-native FMA on bf16-capable VPUs (v6e / v7x), f32
    # everywhere else (v5e has no bf16 VPU) and for all non-bf16 inputs.
    gen = _tpu_generation()
    if out_dtype == jnp.bfloat16 and gen is not None and gen >= 6:
        compute_dtype = jnp.dtype(jnp.bfloat16)
    else:
        compute_dtype = jnp.dtype(jnp.float32)

    mean = jnp.asarray(mean, jnp.float32).reshape(C)
    std = jnp.asarray(std, jnp.float32).reshape(C)

    # Precompute per-channel scale/bias so the kernel is a pure FMA.
    scale = 1.0 / std            # (C,)
    bias = -mean * scale         # (C,)
    # One value per flattened (n, c) row, as a lane-broadcastable column.
    scale_rows = jnp.tile(scale, N).reshape(rows, 1).astype(compute_dtype)
    bias_rows = jnp.tile(bias, N).reshape(rows, 1).astype(compute_dtype)

    # Lane-dense flattened view: the last dim is H*W.
    img2 = img.reshape(rows, HW)

    rb, cb = _block_sizes(rows, HW, in_dtype)
    grid = (pl.cdiv(rows, rb), pl.cdiv(HW, cb))

    # Explicit VMEM budget: in+out double-buffers for the actual blocks, plus
    # the tiny lane-padded scale/bias buffers and some compiler scratch slack.
    # Capped well below v7x's 64 MiB physical VMEM; never rely on the default
    # scoped limit (16 MiB on v5e would otherwise block 4 MiB tiles).
    in_block_bytes = rb * cb * in_dtype.itemsize
    out_block_bytes = rb * cb * out_dtype.itemsize
    aux_bytes = 4 * (pl.cdiv(rb, 8) * 8) * 128 * compute_dtype.itemsize
    vmem_limit = 2 * (in_block_bytes + out_block_bytes) + aux_bytes + (4 << 20)
    vmem_limit = int(min(max(vmem_limit, 16 << 20), 48 << 20))

    out2 = pl.pallas_call(
        _normalize_kernel,
        out_shape=jax.ShapeDtypeStruct((rows, HW), out_dtype),
        grid_spec=pltpu.PrefetchScalarGridSpec(
            num_scalar_prefetch=0,
            grid=grid,
            in_specs=[
                pl.BlockSpec((rb, cb), lambda i, j: (i, j)),
                pl.BlockSpec((rb, 1), lambda i, j: (i, 0)),
                pl.BlockSpec((rb, 1), lambda i, j: (i, 0)),
            ],
            out_specs=pl.BlockSpec((rb, cb), lambda i, j: (i, j)),
        ),
        compiler_params=pltpu.CompilerParams(
            dimension_semantics=("parallel", "parallel"),
            vmem_limit_bytes=vmem_limit,
        ),
        cost_estimate=pl.CostEstimate(
            flops=2 * rows * HW,
            transcendentals=0,
            bytes_accessed=rows * HW * (in_dtype.itemsize + out_dtype.itemsize),
        ),
    )(img2, scale_rows, bias_rows)

    return out2.reshape(N, C, H, W)


if __name__ == "__main__":
    key = jax.random.PRNGKey(0)
    N, C, H, W = 2, 4, 16, 16

    k_img, _ = jax.random.split(key)
    img = jax.random.normal(k_img, (N, C, H, W), dtype=jnp.float32)

    # Deterministic "parameters" (analogous to ImageNet-style per-channel stats).
    mean = jnp.linspace(0.4, 0.5, C, dtype=jnp.float32)
    std = jnp.linspace(0.2, 0.3, C, dtype=jnp.float32)

    out = normalization_forward(img, mean, std)
    out = jax.block_until_ready(out)

    # Reference check (plain JAX, same math as the PyTorch module).
    ref = (img - mean.reshape(-1, 1, 1)) / std.reshape(-1, 1, 1)
    assert out.shape == (N, C, H, W)
    assert out.dtype == img.dtype
    # Note: scale/bias FMA vs (x - m)/s can differ in the last ulp; keep a
    # reasonable tolerance rather than exact-divide equality.
    assert jnp.allclose(out, ref, atol=1e-5, rtol=1e-5)

    print("KERNEL_OK")
</pallas_src>

<mosaic_0001>
module attributes {stable_mosaic.version = 11 : i64} {
  func.func @_normalize_kernel(%arg0: i32, %arg1: i32, %arg2: memref<8x256xf32, #tpu.memory_space<vmem>>, %arg3: memref<8x1xf32, #tpu.memory_space<vmem>>, %arg4: memref<8x1xf32, #tpu.memory_space<vmem>>, %arg5: memref<8x256xf32, #tpu.memory_space<vmem>>) attributes {dimension_semantics = [#tpu.dimension_semantics<parallel>, #tpu.dimension_semantics<parallel>], iteration_bounds = array<i64: 1, 1>, scalar_prefetch = 0 : i64, scratch_operands = 0 : i64, tpu.core_type = #tpu.core_type<tc>, window_params = [{transform_indices = @transform_0, window_bounds = array<i64: 8, 256>}, {transform_indices = @transform_1, window_bounds = array<i64: 8, 1>}, {transform_indices = @transform_2, window_bounds = array<i64: 8, 1>}, {transform_indices = @transform_3, window_bounds = array<i64: 8, 256>}]} {
    %c0 = arith.constant 0 : index
    %c0_0 = arith.constant 0 : index
    %0 = vector.load %arg2[%c0, %c0_0] : memref<8x256xf32, #tpu.memory_space<vmem>>, vector<8x256xf32>
    %c0_1 = arith.constant 0 : index
    %c0_2 = arith.constant 0 : index
    %1 = vector.load %arg3[%c0_1, %c0_2] : memref<8x1xf32, #tpu.memory_space<vmem>>, vector<8x1xf32>
    %2 = vector.broadcast %1 : vector<8x1xf32> to vector<8x256xf32>
    %3 = arith.mulf %0, %2 : vector<8x256xf32>
    %c0_3 = arith.constant 0 : index
    %c0_4 = arith.constant 0 : index
    %4 = vector.load %arg4[%c0_3, %c0_4] : memref<8x1xf32, #tpu.memory_space<vmem>>, vector<8x1xf32>
    %5 = vector.broadcast %4 : vector<8x1xf32> to vector<8x256xf32>
    %6 = arith.addf %3, %5 : vector<8x256xf32>
    %c0_5 = arith.constant 0 : index
    %c0_6 = arith.constant 0 : index
    %7 = vector.load %arg5[%c0_5, %c0_6] : memref<8x256xf32, #tpu.memory_space<vmem>>, vector<8x256xf32>
    tpu.vector_store %arg5[%c0_5, %c0_6], %6 {strides = array<i32>} : memref<8x256xf32, #tpu.memory_space<vmem>>, vector<8x256xf32>,
    return
  }
  func.func @transform_0(%arg0: i32, %arg1: i32) -> (i32, i32) {
    %c0_i32 = arith.constant 0 : i32
    return %arg0, %arg1 : i32, i32
  }
  func.func @transform_1(%arg0: i32, %arg1: i32) -> (i32, i32) {
    %c0_i32 = arith.constant 0 : i32
    %c0_i32_0 = arith.constant 0 : i32
    return %arg0, %c0_i32 : i32, i32
  }
  func.func @transform_2(%arg0: i32, %arg1: i32) -> (i32, i32) {
    %c0_i32 = arith.constant 0 : i32
    %c0_i32_0 = arith.constant 0 : i32
    return %arg0, %c0_i32 : i32, i32
  }
  func.func @transform_3(%arg0: i32, %arg1: i32) -> (i32, i32) {
    %c0_i32 = arith.constant 0 : i32
    return %arg0, %arg1 : i32, i32
  }
}

</mosaic_0001>

<bundles_post_ra>
// kernel: tpu_custom_call.1
= control target key start
LH: loop header
LB: loop body
LE: loop exit
PB: predicated region body
PF: predicated region fallthrough
CT: control target
= control target key end

     0   :  { %s122_s0 = inlined_call_operand.vmem [shape: f32[8,256], index: 0, kind: input, shape index: {}]   ;;  %s123_s1 = inlined_call_operand.vmem [shape: f32[8,1], index: 1, kind: input, shape index: {}]   ;;  %s124_s2 = inlined_call_operand.vmem [shape: f32[8,1], index: 2, kind: input, shape index: {}]   ;;  %s125_s3 = inlined_call_operand.hbm [shape: f32[8,256], index: 3, kind: output, shape index: {}]  }
   0x1   :  { %v17_v0 = vld [vmem:[%s123_s1] sm:$0xff] }
   0x2   :  { %8 = vsyncpa [#allocation3], 0  ;;  %v76_v1 = vmov 0   ;;  %v25_v2 = vld [vmem:[%s124_s2] sm:$0xff]  ;;  %v16_v5 = vld [vmem:[%s122_s0 + $0x8] sm:$0xff]  ;;  %s77_s20 = smov [#allocation2]  }
   0x3   :  { %51 = vset.pattern.permute.xlu0 %v76_v1  ;;  %v15_v4 = vld [vmem:[%s122_s0] sm:$0xff]  ;;  %s41_s1 = sshll.u32 %s77_s20, 4  ;;  %s42_s1 = int_to_ptr.vmem [resolvable:$true] %s41_s1 }
   0x4   :  { %20 = vperm.xlu0 %51, %v17_v0   ;;  %s52_s2 = scalar_lea.vmem %s42_s1, 256  ;;  %p57_p1 = scmp.lt.s32.totalorder %s42_s1, %s42_s1 }
   0x5   :  { %p53_p0 = scmp.ne.s32.totalorder %s42_s1, %s52_s2  ;;  %p58_p2 = scmp.lt.s32.totalorder %s52_s2, %s52_s2 }
   0x7   :  { %p59_p3 = por %p58_p2, %p57_p1 }
   0x8   :  { %28 = vperm.xlu0 %51, %v25_v2  }
   0x9   :  { %p60_p4 = pnand %p59_p3, %p53_p0 }
  0x83   :  { %v21_v3 = vpop.permute.xlu0 %20 }
  0x84   :  { %v23_v6 = vmul.f32 %v21_v3, %v15_v4  ;;  %v24_v7 = vmul.f32 %v21_v3, %v16_v5 }
  0x87   :  { %v29_v8 = vpop.permute.xlu0 %28 }
  0x88   :  { %v31_v9 = vadd.f32 %v29_v8, %v23_v6  ;;  %v32_v10 = vadd.f32 %v29_v8, %v24_v7 }
  0x8a   :  { %33 = vst [vmem:[#allocation2] sm:$0xff] %v31_v9  ;;  %34 = vst [vmem:[#allocation2 + $0x8] sm:$0xff] %v32_v10 }
  0x8b   :  { %63 = shalt.err (!%p60_p4)
}
  0x8c   :  { %s64_s0 = scalar_lea.hbm %s125_s3, 256 }
  0x8d   :  { %p65_p5 = scmp.ne.s32.totalorder %s125_s3, %s64_s0  ;;  %p68_p6 = scmp.lt.u32.totalorder %s64_s0, %s125_s3 }
  0x8f   :  { %p70_p7 = pnand %p68_p6, %p65_p5 }
  0x91   :  { %73 = shalt.err (!%p70_p7)
}
  0x92   :  { %44 = dma.vmem_to_hbm [thread:$0]  %s42_s1, 256, %s125_s3, [#allocation3]  }
  0x93   :  { %74 = dma.done.wait [#allocation3], 256  }
  0x94   :  { %75 = vsyncadd [#allocation3], 4294967040 }
  0x95   :  { %48 = vsyncpa [#allocation3], 1 }

</bundles_post_ra>
